<compile_context>
chip_gen: v7x
topology: tpu7x:2x2x1
jax: 0.10.0
libtpu: 0.0.40
codegen_flags: <defaults>
</compile_context>

<pallas_src>
import math
import jax
import jax.numpy as jnp
from jax.experimental import pallas as pl
from jax.experimental.pallas import tpu as pltpu


def _make_pe(d_model: int, max_len: int = 5000) -> jnp.ndarray:
    """Sinusoidal positional-encoding table matching the PyTorch __init__ (even d_model).

    Kept in float32 (like the registered buffer); never bulk-cast per call.
    """
    position = jnp.arange(0, max_len, dtype=jnp.float32)[:, None]             # (max_len, 1)
    div_term = jnp.exp(jnp.arange(0, d_model, 2, dtype=jnp.float32)
                       * (-math.log(10000.0) / d_model))                      # (d_model//2,)
    pe = jnp.zeros((max_len, d_model), dtype=jnp.float32)
    pe = pe.at[:, 0::2].set(jnp.sin(position * div_term))
    pe = pe.at[:, 1::2].set(jnp.cos(position * div_term))
    return pe


def _add_pe_kernel(x_ref, pe_ref, o_ref):
    # x_ref / o_ref: (TB, TS, D'); pe_ref: (TS, D') in f32.
    # Upcast to f32, add once, round once on store (matches PyTorch's f32 pe buffer).
    x = x_ref[...].astype(jnp.float32)
    pe = pe_ref[...].astype(jnp.float32)
    o_ref[...] = (x + pe[None, :, :]).astype(o_ref.dtype)


def positional_encoding_forward(x: jnp.ndarray, pe: jnp.ndarray,
                                *, target_tile_bytes: int = 2 << 20) -> jnp.ndarray:
    """x: (B, S, D); pe: (max_len, D) float32 table. Returns x + pe[:S, :].

    Note: output dtype is x.dtype (conventional); raise target_tile_bytes to ~4 MiB
    on v7x if desired — vmem_limit_bytes below is derived from the actual tiles.
    """
    B, S, D = x.shape
    max_len, d_pe = pe.shape
    assert d_pe == D, "pe table feature dim must match x"
    assert S <= max_len, "sequence length exceeds positional-encoding table"

    elem = jnp.dtype(x.dtype).itemsize
    # Packed sublane granularity: 8 rows for f32, 16 for bf16, 32 for int8/fp8.
    sub = max(8, 32 // elem)

    # Lane-folding factor: smallest k with (k*D) % 128 == 0. Folding k sequence rows
    # into the lane axis is a free contiguous reshape and makes every store lane-dense.
    k = 128 // math.gcd(D, 128)
    if k > 1 and S % k == 0 and max_len % k == 0:
        Dp, Sp, maxlen_p = D * k, S // k, max_len // k
        x_in = x.reshape(B, Sp, Dp)          # contiguous row-merge: free under jit
        pe_in = pe.reshape(maxlen_p, Dp)     # full-table bitcast reshape: free under jit
    else:
        k, Dp, Sp, maxlen_p = 1, D, S, max_len
        x_in, pe_in = x, pe

    if Sp < sub:
        # Degenerate sequence length: fixed per-step overhead dominates and (8,128)
        # tiling has nothing to bite on; plain XLA on just the S needed rows is optimal.
        return (x.astype(jnp.float32) + pe[:S, :][None, :, :]).astype(x.dtype)

    # Sequence tile (rows of the folded layout): ~target_tile_bytes, sublane-aligned.
    ts = max(sub, target_tile_bytes // (Dp * elem))
    ts = min(ts, Sp)
    ts = max(sub, (ts // sub) * sub)
    num_s_tiles = pl.cdiv(Sp, ts)

    # Short-S / large-B: fatten the tile along the batch axis so each grid step moves
    # a roofline-friendly amount of data instead of B tiny steps.
    tb = 1
    if num_s_tiles == 1 and B > 1:
        want = max(1, target_tile_bytes // (ts * Dp * elem))
        for cand in range(min(B, want), 0, -1):
            if B % cand == 0:
                tb = cand
                break
    num_b_tiles = pl.cdiv(B, tb)

    # v7x megacore: make sure both TensorCores get at least one grid step when possible.
    if num_s_tiles * num_b_tiles < 2 and Sp >= 2 * sub:
        ts = max(sub, ((ts // 2) // sub) * sub)
        num_s_tiles = pl.cdiv(Sp, ts)

    # Explicit scoped-VMEM budget: double-buffered x + out tiles + double-buffered pe
    # tile, plus headroom. Stays within v5e's physical VMEM and v7x's 32 MiB default.
    x_tile_bytes = tb * ts * Dp * elem
    pe_tile_bytes = ts * Dp * jnp.dtype(pe_in.dtype).itemsize
    vmem_limit = int(min(max(2 * (2 * x_tile_bytes + pe_tile_bytes) + (4 << 20),
                             16 << 20), 32 << 20))

    out = pl.pallas_call(
        _add_pe_kernel,
        out_shape=jax.ShapeDtypeStruct((B, Sp, Dp), x.dtype),
        grid_spec=pltpu.PrefetchScalarGridSpec(
            num_scalar_prefetch=0,
            # S-tiles outer, batch-tiles inner: the pe block index is constant across
            # the inner loop, so each pe tile is fetched once per S-tile.
            grid=(num_s_tiles, num_b_tiles),
            in_specs=[
                pl.BlockSpec((tb, ts, Dp), lambda s, b: (b, s, 0)),
                pl.BlockSpec((ts, Dp), lambda s, b: (s, 0)),   # rows of the FULL pe table
            ],
            out_specs=pl.BlockSpec((tb, ts, Dp), lambda s, b: (b, s, 0)),
        ),
        compiler_params=pltpu.CompilerParams(
            dimension_semantics=("parallel", "parallel"),
            vmem_limit_bytes=vmem_limit,
        ),
    )(x_in, pe_in)

    return out.reshape(B, S, D)


if __name__ == "__main__":
    B, S, D = 2, 64, 32
    max_len = 5000

    key = jax.random.PRNGKey(0)
    x = jax.random.normal(key, (B, S, D), dtype=jnp.float32)
    pe = _make_pe(D, max_len)

    fwd = jax.jit(positional_encoding_forward)
    out = jax.block_until_ready(fwd(x, pe))

    # Reference check (plain JAX)
    ref = x + pe[:S, :][None, :, :]
    assert out.shape == (B, S, D)
    assert jnp.allclose(out, ref, atol=1e-6, rtol=1e-6), "mismatch vs reference"

    print("KERNEL_OK")
</pallas_src>

<mosaic_0001>
module attributes {stable_mosaic.version = 11 : i64} {
  func.func @_add_pe_kernel(%arg0: i32, %arg1: i32, %arg2: memref<2x8x128xf32, #tpu.memory_space<vmem>>, %arg3: memref<8x128xf32, #tpu.memory_space<vmem>>, %arg4: memref<2x8x128xf32, #tpu.memory_space<vmem>>) attributes {dimension_semantics = [#tpu.dimension_semantics<parallel>, #tpu.dimension_semantics<parallel>], iteration_bounds = array<i64: 2, 1>, scalar_prefetch = 0 : i64, scratch_operands = 0 : i64, tpu.core_type = #tpu.core_type<tc>, window_params = [{transform_indices = @transform_0, window_bounds = array<i64: 2, 8, 128>}, {transform_indices = @transform_1, window_bounds = array<i64: 8, 128>}, {transform_indices = @transform_2, window_bounds = array<i64: 2, 8, 128>}]} {
    %c0 = arith.constant 0 : index
    %c0_0 = arith.constant 0 : index
    %c0_1 = arith.constant 0 : index
    %0 = vector.load %arg2[%c0, %c0_0, %c0_1] : memref<2x8x128xf32, #tpu.memory_space<vmem>>, vector<2x8x128xf32>
    %c0_2 = arith.constant 0 : index
    %c0_3 = arith.constant 0 : index
    %1 = vector.load %arg3[%c0_2, %c0_3] : memref<8x128xf32, #tpu.memory_space<vmem>>, vector<8x128xf32>
    %2 = vector.shape_cast %1 : vector<8x128xf32> to vector<1x8x128xf32>
    %3 = vector.broadcast %2 : vector<1x8x128xf32> to vector<2x8x128xf32>
    %4 = arith.addf %0, %3 : vector<2x8x128xf32>
    %c0_4 = arith.constant 0 : index
    %c0_5 = arith.constant 0 : index
    %c0_6 = arith.constant 0 : index
    %5 = vector.load %arg4[%c0_4, %c0_5, %c0_6] : memref<2x8x128xf32, #tpu.memory_space<vmem>>, vector<2x8x128xf32>
    tpu.vector_store %arg4[%c0_4, %c0_5, %c0_6], %4 {strides = array<i32>} : memref<2x8x128xf32, #tpu.memory_space<vmem>>, vector<2x8x128xf32>,
    return
  }
  func.func @transform_0(%arg0: i32, %arg1: i32) -> (i32, i32, i32) {
    %c0_i32 = arith.constant 0 : i32
    %c0_i32_0 = arith.constant 0 : i32
    return %arg1, %arg0, %c0_i32 : i32, i32, i32
  }
  func.func @transform_1(%arg0: i32, %arg1: i32) -> (i32, i32) {
    %c0_i32 = arith.constant 0 : i32
    %c0_i32_0 = arith.constant 0 : i32
    return %arg0, %c0_i32 : i32, i32
  }
  func.func @transform_2(%arg0: i32, %arg1: i32) -> (i32, i32, i32) {
    %c0_i32 = arith.constant 0 : i32
    %c0_i32_0 = arith.constant 0 : i32
    return %arg1, %arg0, %c0_i32 : i32, i32, i32
  }
}

</mosaic_0001>

<bundles_post_ra>
// kernel: positional_encoding_forward.1
= control target key start
LH: loop header
LB: loop body
LE: loop exit
PB: predicated region body
PF: predicated region fallthrough
CT: control target
= control target key end

     0   :  { %s459_s9 = smov 0   ;;  %s461_s10 = smov 0   ;;  %s536_s0 = inlined_call_operand.vmem [shape: f32[2,16,128], index: 0, kind: input, shape index: {}]   ;;  %s537_s1 = inlined_call_operand.vmem [shape: f32[1250,128], index: 1, kind: input, shape index: {}]   ;;  %s538_s2 = inlined_call_operand.vmem [shape: f32[2,16,128], index: 2, kind: output, shape index: {}]  }
   0x1   :  { %s463_s11 = smov 0   ;;  %s465_s12 = smov 0  }
   0x2   :  { %s467_s13 = smov 0  }
   0x3 LB: > { %s24_s14 = sadd.s32 1, %s438_s12  ;;  %s350_s15 = sadd.s32 4294967295, %s442_s13   ;;  %s442_s13 = sphi %s467_s13, %s12_s13   ;;  %s438_s12 = sphi %s465_s12, %s543_s12   ;;  %s434_s11 = sphi %s463_s11, %s542_s11   ;;  %s430_s10 = sphi %s461_s10, %s541_s10   ;;  %s426_s9 = sphi %s459_s9, %s540_s9  }
   0x4   : > { %p26_p0 = scmp.ge.s32.totalorder %s24_s14, 2  ;;  %p40_p1 = scmp.ne.s32.totalorder %s430_s10, %s426_s9 }
   0x5   : > { %p41_p2 = scmp.eq.s32.totalorder %s442_s13, 0  ;;  %p98_p4 = scmp.eq.s32.totalorder %s350_s15, 1 }
   0x6   : > { %s545_s14 = smov (%p26_p0, %s24_s14), 0  ;;  %s33_s17 = sadd.s32 1, %s430_s10 }
   0x7   : > { %p42_p3 = por %p41_p2, %p40_p1  ;;  %s29_s16 = ssub.s32 %s438_s12, %s545_s14 }
   0x8   : > { %p31_p5 = scmp.eq.s32.totalorder %s29_s16, 0  ;;  %p494_p6 = por %p98_p4, %p40_p1 }
   0x9   : > { %p353_p7 = scmp.ge.s32.totalorder %s442_s13, 2 }
   0xa   : > { %s499_s19 = scalar_select %p31_p5, %s430_s10, %s33_s17  }
   0xb   : > { %120 = sbr.rel (%p353_p7) target bundleno = 25 (0x19), region = 16 }
  0x12   : > { %123 = sbr.rel (!%p42_p3) target bundleno = 25 (0x19), region = 20  ;;  %s125_s20 = sand.u32 (%p42_p3), 1, %s430_s10  }
  0x13   : > { %s355_s21 = sshll.u32 (%p42_p3), %s438_s12, 3  ;;  %s354_s22 = sshll.u32 (%p42_p3), %s125_s20, 4 }
  0x14   : > { %s132_s25 = scalar_lea.vmem (%p42_p3), %s536_s0, %s355_s21  ;;  %s127_s26 = scalar_lea.vmem (%p42_p3), [#allocation2], %s354_s22 }
  0x15   : > { %v162_v0 = vld [vmem:[%s132_s25] sm:$0xff] (%p42_p3)  ;;  %v164_v1 = vld [vmem:[%s132_s25 + $0x10] sm:$0xff] (%p42_p3) }
  0x16   : > { %163 = vst [vmem:[%s127_s26] sm:$0xff] (%p42_p3), %v162_v0  ;;  %165 = vst [vmem:[%s127_s26 + $0x8] sm:$0xff] (%p42_p3), %v164_v1 }
  0x19 PF: > { %p356_p8 = scmp.ge.s32.totalorder %s442_s13, 1  ;;  %p177_p9 = scmp.lt.s32.totalorder %s442_s13, 3 }
  0x1b   : > { %p178_p10 = pnand %p356_p8, %p177_p9 }
  0x1c   : > { %s184_s27 = sand.u32 (!%p178_p10), 1, %s426_s9   ;;  %p209_p11 = scmp.lt.s32.totalorder (!%p178_p10), %s434_s11, 156 }
  0x1d   : > { %181 = sbr.rel (%p178_p10) target bundleno = 52 (0x34), region = 62  ;;  %s357_s28 = sshll.u32 (!%p178_p10), %s184_s27, 4 }
  0x1e   : > { %s186_s3 = scalar_lea.vmem (!%p178_p10), [#allocation2], %s357_s28  ;;  %s207_s7 = scalar_lea.vmem (!%p178_p10), [#allocation3], %s357_s28 }
  0x1f   : > { %v214_v2 = vld [vmem:[%s186_s3] sm:$0xff] (!%p178_p10)  ;;  %v215_v3 = vld [vmem:[%s186_s3 + $0x8] sm:$0xff] (!%p178_p10) }
  0x24   : > { %s210_s29 = scalar_select %p209_p11, %s434_s11, 156 }
  0x25   : > { %227 = sbr.rel (!%p494_p6) target bundleno = 52 (0x34), region = 70  ;;  %s361_s8 = sshll.u32 (%p494_p6), %s434_s11, 3 }
  0x26   : > { %s359_s30 = sshll.u32 %s210_s29, 3  ;;  %s232_s16 = scalar_lea.vmem (%p494_p6), %s538_s2, %s361_s8 }
  0x27   : > { %s212_s6 = scalar_lea.vmem %s537_s1, %s359_s30 }
  0x28   : > { %v216_v4 = vld [vmem:[%s212_s6] sm:$0xff] }
  0x29   : > { %v217_v5 = vadd.f32 %v216_v4, %v214_v2  ;;  %v218_v6 = vadd.f32 %v216_v4, %v215_v3 }
  0x2b   : > { %219 = vst [vmem:[%s207_s7] sm:$0xff] %v217_v5  ;;  %220 = vst [vmem:[%s207_s7 + $0x8] sm:$0xff] %v218_v6 }
  0x32   : > { %v262_v7 = vld [vmem:[%s207_s7] sm:$0xff]  ;;  %v264_v8 = vld [vmem:[%s207_s7 + $0x8] sm:$0xff] }
  0x33   : > { %263 = vst [vmem:[%s232_s16] sm:$0xff] %v262_v7  ;;  %265 = vst [vmem:[%s232_s16 + $0x10] sm:$0xff] %v264_v8 }
  0x34 PF: > { %s12_s13 = sadd.s32 1, %s442_s13   ;;  %s540_s9 = smov %s430_s10 }
  0x35   : > { %p9_p12 = scmp.ge.s32.totalorder %s12_s13, 4   ;;  %s541_s10 = smov %s499_s19 }
  0x36   : > { %s542_s11 = smov %s438_s12  ;;  %s543_s12 = smov %s545_s14 }
  0x37   :  { %11 = sbr.rel (!%p9_p12) target bundleno = 3 (0x3), region = 142 }

</bundles_post_ra>
